<compile_context>
chip_gen: v5e
topology: v5e:2x2
jax: 0.10.0
libtpu: 0.0.40
codegen_flags: <defaults>
</compile_context>

<pallas_src>
import jax
import jax.numpy as jnp
from jax.experimental import pallas as pl
from jax.experimental.pallas import tpu as pltpu

EMB_DIM = 32
HEAD = 8
NUM_PATCH = int(8 * 8 + 4 * 4 + 2 * 2 + 1)   # 85 -> embedding tables have 86 rows
POS_DIM = EMB_DIM // HEAD                     # 4
SCALE = 1.0 / (POS_DIM ** 0.5)                # 1/2


def _attn_kernel(q_tbl_ref, k_tbl_ref, o_ref):
    # q_tbl_ref / k_tbl_ref: (43, 2*EMB_DIM) f32 "paired-row" view of the
    # embedding tables; lanes [0:EMB_DIM) of view-row j hold table row 2*j.
    # o_ref: (1, S) f32, lane-dense.
    S = o_ref.shape[1]
    q = q_tbl_ref[:S, :EMB_DIM]          # (S, D) == query_emb[2*j]
    k = k_tbl_ref[:S, :EMB_DIM]          # (S, D) == key_emb[2*j]

    # scores^T[j, i] = k_j . q_i  — contract last dims directly on the MXU,
    # no transpose materialized.
    scores_t = jax.lax.dot_general(
        k, q, (((1,), (1,)), ((), ())),
        preferred_element_type=jnp.float32)          # (S_key, S_query)

    # Numerically-stable softmax over the key axis (sublanes), with the
    # 1/sqrt(pos_dim) scale folded into the exponent.
    m = jnp.max(scores_t, axis=0, keepdims=True)     # (1, S_query)
    e = jnp.exp((scores_t - m) * SCALE)              # (S_key, S_query)  EUP

    # value vector v[j] = 2*j synthesized in-kernel (no DMA).
    v_col = 2.0 * jax.lax.broadcasted_iota(
        jnp.int32, (S, 1), 0).astype(jnp.float32)    # (S_key, 1)

    # dropout(p, 0.0) is the identity.
    # out[i] = sum_j softmax(.)[i, j] * v[j] = (sum_j e*v) / (sum_j e)
    num = jnp.sum(e * v_col, axis=0, keepdims=True)  # (1, S_query)  VPU+XLU
    den = jnp.sum(e, axis=0, keepdims=True)          # (1, S_query)
    # Exact reciprocal keeps the 1e-5 check; approx=True is also valid with a
    # looser tolerance (EUP slot either way, off the critical path here).
    o_ref[...] = num * pl.reciprocal(den, approx=False)


def _attention_pallas(q_tbl2, k_tbl2, seq_len):
    rows, d2 = q_tbl2.shape
    return pl.pallas_call(
        _attn_kernel,
        out_shape=jax.ShapeDtypeStruct((1, seq_len), jnp.float32),
        grid=(1,),
        in_specs=[
            pl.BlockSpec((rows, d2), lambda i: (0, 0)),
            pl.BlockSpec((rows, d2), lambda i: (0, 0)),
        ],
        out_specs=pl.BlockSpec((1, seq_len), lambda i: (0, 0)),
        compiler_params=pltpu.CompilerParams(
            dimension_semantics=("arbitrary",)),
    )(q_tbl2, k_tbl2)


@jax.jit
def model_forward(x0, query_emb_w, key_emb_w):
    n = x0.shape[1]
    # torch.nn.Embedding would raise for indices >= NUM_PATCH + 1 (n > 43);
    # JAX would silently clamp, so fail loudly instead.
    if 2 * (n - 1) > NUM_PATCH:
        raise ValueError("embedding index 2*(n-1) out of range for the table")
    # Free contiguous reshape: (86, 32) -> (43, 64); view-row j holds original
    # rows (2j, 2j+1) side by side on the lane axis.
    q_tbl2 = query_emb_w.reshape(-1, 2 * EMB_DIM)
    k_tbl2 = key_emb_w.reshape(-1, 2 * EMB_DIM)
    out = _attention_pallas(q_tbl2, k_tbl2, n)       # (1, n), lane-dense
    return out[0]                                    # (n,)


if __name__ == "__main__":
    key = jax.random.PRNGKey(0)
    k_x, k_q, k_k = jax.random.split(key, 3)

    # x0: only x0.shape[1] matters; use seq = 8 for non-degenerate compute.
    x0 = jax.random.randint(k_x, (8, 8), -5, 8, dtype=jnp.int32)

    # Deterministic embedding tables (nn.Embedding default init ~ N(0, 1)).
    query_emb_w = jax.random.normal(k_q, (NUM_PATCH + 1, EMB_DIM), jnp.float32)
    key_emb_w = jax.random.normal(k_k, (NUM_PATCH + 1, EMB_DIM), jnp.float32)

    out = model_forward(x0, query_emb_w, key_emb_w)
    out = jax.block_until_ready(out)

    # Pure-JAX reference (mirrors the torch broadcasting chain exactly).
    n = x0.shape[1]
    v5 = (jnp.arange(n)[:, None] + jnp.arange(n)[None, :, None]).reshape(-1)
    q_ref = query_emb_w[v5]
    k_ref = key_emb_w[v5]
    scores = (q_ref @ k_ref.T) / (POS_DIM ** 0.5)
    ref = jax.nn.softmax(scores, axis=-1) @ v5.astype(jnp.float32)
    assert out.shape == ref.shape
    assert jnp.allclose(out, ref, atol=1e-5, rtol=1e-5)

    print("KERNEL_OK")
</pallas_src>

<mosaic_0001>
module attributes {stable_mosaic.version = 11 : i64} {
  func.func @_attn_kernel(%arg0: i32, %arg1: memref<43x64xf32, #tpu.memory_space<vmem>>, %arg2: memref<43x64xf32, #tpu.memory_space<vmem>>, %arg3: memref<1x8xf32, #tpu.memory_space<vmem>>) attributes {dimension_semantics = [#tpu.dimension_semantics<arbitrary>], iteration_bounds = array<i64: 1>, scalar_prefetch = 0 : i64, scratch_operands = 0 : i64, tpu.core_type = #tpu.core_type<tc>, window_params = [{pipeline_mode = #tpu.pipeline_mode<synchronous>, transform_indices = @transform_0, window_bounds = array<i64: 43, 64>}, {pipeline_mode = #tpu.pipeline_mode<synchronous>, transform_indices = @transform_1, window_bounds = array<i64: 43, 64>}, {pipeline_mode = #tpu.pipeline_mode<synchronous>, transform_indices = @transform_2, window_bounds = array<i64: 1, 8>}]} {
    %c0 = arith.constant 0 : index
    %c0_0 = arith.constant 0 : index
    %0 = vector.load %arg1[%c0, %c0_0] : memref<43x64xf32, #tpu.memory_space<vmem>>, vector<8x32xf32>
    %c0_1 = arith.constant 0 : index
    %c0_2 = arith.constant 0 : index
    %1 = vector.load %arg2[%c0_1, %c0_2] : memref<43x64xf32, #tpu.memory_space<vmem>>, vector<8x32xf32>
    %cst = arith.constant dense<0.000000e+00> : vector<8x8xf32>
    %2 = tpu.matmul %1, %0, %cst {dimension_numbers = #tpu.dot_dimension_numbers<[1], [1], [0], [0], [0, 0, 1, 0], [], []>} : vector<8x32xf32>, vector<8x32xf32>, vector<8x8xf32> -> vector<8x8xf32>
    %cst_3 = arith.constant dense<0xFF800000> : vector<8xf32>
    %3 = vector.multi_reduction <maximumf>, %2, %cst_3 [0] : vector<8x8xf32> to vector<8xf32>
    %4 = vector.shape_cast %3 : vector<8xf32> to vector<1x8xf32>
    %5 = vector.broadcast %4 : vector<1x8xf32> to vector<8x8xf32>
    %6 = arith.subf %2, %5 : vector<8x8xf32>
    %cst_4 = arith.constant 5.000000e-01 : f32
    %7 = vector.broadcast %cst_4 : f32 to vector<8x8xf32>
    %8 = arith.mulf %6, %7 : vector<8x8xf32>
    %9 = math.exp %8 : vector<8x8xf32>
    %10 = tpu.iota {dimensions = array<i32: 0>} : vector<8x1xi32>
    %11 = arith.sitofp %10 : vector<8x1xi32> to vector<8x1xf32>
    %cst_5 = arith.constant 2.000000e+00 : f32
    %12 = vector.broadcast %cst_5 : f32 to vector<8x1xf32>
    %13 = arith.mulf %12, %11 : vector<8x1xf32>
    %14 = vector.broadcast %13 : vector<8x1xf32> to vector<8x8xf32>
    %15 = arith.mulf %9, %14 : vector<8x8xf32>
    %cst_6 = arith.constant dense<0.000000e+00> : vector<8xf32>
    %16 = vector.multi_reduction <add>, %15, %cst_6 [0] : vector<8x8xf32> to vector<8xf32>
    %17 = vector.shape_cast %16 : vector<8xf32> to vector<1x8xf32>
    %cst_7 = arith.constant dense<0.000000e+00> : vector<8xf32>
    %18 = vector.multi_reduction <add>, %9, %cst_7 [0] : vector<8x8xf32> to vector<8xf32>
    %19 = vector.shape_cast %18 : vector<8xf32> to vector<1x8xf32>
    %20 = tpu.reciprocal %19 : vector<1x8xf32> -> vector<1x8xf32>
    %21 = arith.mulf %17, %20 : vector<1x8xf32>
    %c0_8 = arith.constant 0 : index
    %c0_9 = arith.constant 0 : index
    %22 = vector.load %arg3[%c0_8, %c0_9] : memref<1x8xf32, #tpu.memory_space<vmem>>, vector<1x8xf32>
    tpu.vector_store %arg3[%c0_8, %c0_9], %21 {strides = array<i32>} : memref<1x8xf32, #tpu.memory_space<vmem>>, vector<1x8xf32>,
    return
  }
  func.func @transform_0(%arg0: i32) -> (i32, i32) {
    %c0_i32 = arith.constant 0 : i32
    %c0_i32_0 = arith.constant 0 : i32
    %c0_i32_1 = arith.constant 0 : i32
    return %c0_i32, %c0_i32_0 : i32, i32
  }
  func.func @transform_1(%arg0: i32) -> (i32, i32) {
    %c0_i32 = arith.constant 0 : i32
    %c0_i32_0 = arith.constant 0 : i32
    %c0_i32_1 = arith.constant 0 : i32
    return %c0_i32, %c0_i32_0 : i32, i32
  }
  func.func @transform_2(%arg0: i32) -> (i32, i32) {
    %c0_i32 = arith.constant 0 : i32
    %c0_i32_0 = arith.constant 0 : i32
    %c0_i32_1 = arith.constant 0 : i32
    return %c0_i32, %c0_i32_0 : i32, i32
  }
}

</mosaic_0001>

<bundles_post_ra>
// kernel: model_forward.1
= control target key start
LH: loop header
LB: loop body
LE: loop exit
PB: predicated region body
PF: predicated region fallthrough
CT: control target
= control target key end

     0   :  { %vm14_vm0 = vcmask 261120   ;;  %s166_s0 = inlined_call_operand.vmem [shape: f32[43,64], index: 0, kind: input, shape index: {}]   ;;  %s167_s1 = inlined_call_operand.vmem [shape: f32[43,64], index: 1, kind: input, shape index: {}]   ;;  %s168_s2 = inlined_call_operand.hbm [shape: f32[1,8], index: 2, kind: output, shape index: {}]  }
   0x1   :  { %v12_v0 = vld [vmem:[%s166_s0] sm:$0xff] }
   0x2   :  { %7 = vsyncpa [#allocation3], 0  ;;  %105 = vmatpush.xpose.msk.msra.mxu0 %vm14_vm0, %v12_v0  ;;  %v13_v1 = vld [vmem:[%s167_s1] sm:$0xff]  ;;  %vm41_vm1 = vcmask 64512   ;;  %v53_v10 = vlaneseq  ;;  %s138_s0 = smov [#allocation2]   ;;  %s96_s15 = sshll.u32 %s168_s2, 4  ;;  %s97_s15 = int_to_ptr.hbm [resolvable:$true] %s96_s15 }
   0x3   :  { %s94_s1 = sshll.u32 %s138_s0, 4  ;;  %vm87_vm6 = vcmask 57344   ;;  %s95_s1 = int_to_ptr.vmem [resolvable:$true] %s94_s1 }
   0x4   :  { %v54_v13 = vshrl.u32 %v53_v10, 7 }
   0x5   :  { %106 = vmatmul.msk.f32.vlgmr.msra.gmra.mxu0 %vm14_vm0, %v13_v1 }
   0x6   :  { %v55_v15 = vcvt.s32.f32 %v54_v13 }
   0x8   :  { %v56_v16 = vmul.f32 2.0, %v55_v15 }
  0x82   :  { %v38_v2 = vpop.f32.mrf.mxu0 }
  0x83   :  { %v42_v3 = vsel %vm41_vm1, %v38_v2, -inf }
  0x84   :  { %v43_v4 = vrot.slane %v42_v3, 4 }
  0x86   :  { %v44_v5 = vmax.f32 %v42_v3, %v43_v4 }
  0x88   :  { %v45_v6 = vrot.slane %v44_v5, 2 }
  0x8a   :  { %v46_v7 = vmax.f32 %v44_v5, %v45_v6 }
  0x8c   :  { %v47_v8 = vrot.slane %v46_v7, 1 }
  0x8e   :  { %v48_v9 = vmax.f32 %v46_v7, %v47_v8 }
  0x90   :  { %v49_v11 = vsub.f32 %v38_v2, %v48_v9 }
  0x92   :  { %v50_v12 = vmul.f32 0.5, %v49_v11 }
  0x94   :  { %v51_v14 = vmul.f32 1.442695, %v50_v12 }
  0x96   :  { %108 = vpow2.f32 %v51_v14 }
  0x9c   :  { %v109_v17 = vpop.eup %108 }
  0x9d   :  { %v65_v18 = vsel %vm41_vm1, %v109_v17, 0.0  ;;  %v57_v19 = vmul.f32 %v109_v17, %v56_v16 }
  0x9e   :  { %v66_v20 = vrot.slane %v65_v18, 4 }
  0x9f   :  { %v58_v22 = vsel %vm41_vm1, %v57_v19, 0.0 }
  0xa0   :  { %v67_v21 = vadd.f32 %v66_v20, %v65_v18  ;;  %v59_v25 = vrot.slane %v58_v22, 4 }
  0xa2   :  { %v68_v23 = vrot.slane %v67_v21, 2  ;;  %v60_v28 = vadd.f32 %v59_v25, %v58_v22 }
  0xa4   :  { %v69_v24 = vadd.f32 %v68_v23, %v67_v21  ;;  %v61_v29 = vrot.slane %v60_v28, 2 }
  0xa6   :  { %v70_v26 = vrot.slane %v69_v24, 1  ;;  %v62_v31 = vadd.f32 %v61_v29, %v60_v28 }
  0xa8   :  { %v71_v27 = vadd.f32 %v70_v26, %v69_v24  ;;  %v63_v35 = vrot.slane %v62_v31, 1 }
  0xaa   :  { %110 = vrcp.f32 %v71_v27  ;;  %v83_v34 = vand.u32 2147483648, %v71_v27  ;;  %v81_v37 = vand.u32 2147483647, %v71_v27  ;;  %vm77_vm3 = vweird.f32 %v71_v27 }
  0xab   :  { %v64_v40 = vadd.f32 %v63_v35, %v62_v31 }
  0xac   :  { %v84_v39 = vor.u32 1.1754944e-38, %v83_v34  ;;  %vm82_vm5 = vcmp.eq.f32.partialorder %v81_v37, 8.507059e+37 }
  0xb0   :  { %v111_v30 = vpop.eup %110 }
  0xb1   :  { %v73_v32 = vmul.f32 %v111_v30, %v71_v27  ;;  %vm78_vm2 = vweird.f32 %v111_v30 }
  0xb2   :  { %vm79_vm4 = vmor %vm77_vm3, %vm78_vm2 }
  0xb3   :  { %v74_v33 = vsub.f32 1.0, %v73_v32 }
  0xb5   :  { %v75_v36 = vmul.f32 %v111_v30, %v74_v33 }
  0xb7   :  { %v76_v38 = vadd.f32 %v111_v30, %v75_v36 }
  0xb9   :  { %v80_v41 = vsel %vm79_vm4, %v111_v30, %v76_v38 }
  0xba   :  { %v85_v42 = vsel %vm82_vm5, %v84_v39, %v80_v41 }
  0xbb   :  { %v86_v43 = vmul.f32 %v85_v42, %v64_v40 }
  0xbd   :  { %88 = vst.msk [vmem:[#allocation2] sm:$0x1] %vm87_vm6, %v86_v43 }
  0xbe   :  { %99 = dma.vmem_to_hbm [thread:$0]  %s95_s1, 16, %s97_s15, [#allocation3]  }
  0xbf   :  { %136 = dma.done.wait [#allocation3], 16  }
  0xc0   :  { %137 = vsyncadd [#allocation3], 4294967280 }
  0xc1   :  { %104 = vsyncpa [#allocation3], 1 }

</bundles_post_ra>
